<compile_context>
chip_gen: v6e
topology: v6e:2x2x1
jax: 0.10.0
libtpu: 0.0.40
codegen_flags: <defaults>
</compile_context>

<pallas_src>
import jax
import jax.numpy as jnp
from jax import lax
from jax.experimental import pallas as pl
from jax.experimental.pallas import tpu as pltpu

LANE = 128  # pad every feature dim to the 128-lane vreg width


def _pad2(a, rows, cols):
    r, c = a.shape
    return jnp.pad(a, ((0, rows - r), (0, cols - c)))


def encoder_kernel(x_ref, w_ref, v_ref, out_ref):
    """x_ref: (B, 128) f32, w_ref: (4, 128, 128) f32|bf16, v_ref: (8, 128) f32.

    v_ref rows: 0=b1, 1=b2, 2=b3, 3=bz, 4=gamma, 5=beta (rows 6,7 are padding).
    """
    f32 = jnp.float32
    mxu_dtype = w_ref.dtype  # f32 or bf16 (static at trace time)

    def dense(h, layer):
        # MXU matmul; accumulate in f32, bias add in f32.
        acc = jnp.dot(h.astype(mxu_dtype), w_ref[layer],
                      preferred_element_type=f32)
        return acc + v_ref[layer:layer + 1, :]

    h = jnp.maximum(dense(x_ref[...], 0), 0.0)
    h = jnp.maximum(dense(h, 1), 0.0)
    h = jnp.maximum(dense(h, 2), 0.0)
    z = dense(h, 3)

    # BatchNorm1d (training mode: batch stats, biased variance, eps=1e-5).
    # Entire batch is present in this block, so the statistics are exact.
    mean = jnp.mean(z, axis=0, keepdims=True)
    var = jnp.mean((z - mean) * (z - mean), axis=0, keepdims=True)
    z_hat = (z - mean) * lax.rsqrt(var + 1e-5)
    out_ref[...] = z_hat * v_ref[4:5, :] + v_ref[5:6, :]


def pack_params(params, use_bf16):
    """Pad weights to (128,128) and stack; pack bias/affine vectors into (8,128)."""
    w_dtype = jnp.bfloat16 if use_bf16 else jnp.float32
    w_stack = jnp.stack(
        [_pad2(params[n], LANE, LANE).astype(w_dtype)
         for n in ("w1", "w2", "w3", "wz")], axis=0)          # (4, 128, 128)
    vec_rows = [_pad2(params[n], 1, LANE)
                for n in ("b1", "b2", "b3", "bz", "gamma", "beta")]
    vec_rows.append(jnp.zeros((2, LANE), jnp.float32))        # pad to 8 sublanes
    vecs = jnp.concatenate(vec_rows, axis=0)                  # (8, 128)
    return w_stack, vecs


def encoder_forward(x, params, *, use_bf16=False):
    """x: (B, n_dim) float32. params: dict of (in,out) weights and (1,out) vectors.

    use_bf16=True feeds the MXU bf16 operands (recommended on v6e/v7x); all
    elementwise math and accumulation stay in f32.
    """
    B, n_dim = x.shape
    d0 = params["w1"].shape[1]
    d1 = params["w2"].shape[1]
    d2 = params["w3"].shape[1]
    n_z = params["wz"].shape[1]

    x_pad = _pad2(x.astype(jnp.float32), B, LANE)             # (B, 128), zero-padded
    w_stack, vecs = pack_params(params, use_bf16)

    flops = 2 * B * (n_dim * d0 + d0 * d1 + d1 * d2 + d2 * n_z)
    bytes_accessed = (x_pad.size * x_pad.dtype.itemsize
                      + w_stack.size * w_stack.dtype.itemsize
                      + vecs.size * vecs.dtype.itemsize
                      + B * LANE * 4)

    vmem = pl.BlockSpec(memory_space=pltpu.MemorySpace.VMEM)
    out_pad = pl.pallas_call(
        encoder_kernel,
        out_shape=jax.ShapeDtypeStruct((B, LANE), jnp.float32),
        in_specs=[vmem, vmem, vmem],
        out_specs=vmem,
        cost_estimate=pl.CostEstimate(flops=flops,
                                      transcendentals=LANE,
                                      bytes_accessed=bytes_accessed),
    )(x_pad, w_stack, vecs)

    return out_pad[:, :n_z]


def init_params(key, n_dim, dims, n_z):
    """Deterministic synthetic init; Linear weights stored as (in, out)."""
    ks = jax.random.split(key, 8)

    def lin(kw, kb, fan_in, fan_out):
        bound = 1.0 / jnp.sqrt(fan_in)
        w = jax.random.uniform(kw, (fan_in, fan_out), jnp.float32, -bound, bound)
        b = jax.random.uniform(kb, (1, fan_out), jnp.float32, -bound, bound)
        return w, b

    w1, b1 = lin(ks[0], ks[1], n_dim, dims[0])
    w2, b2 = lin(ks[2], ks[3], dims[0], dims[1])
    w3, b3 = lin(ks[4], ks[5], dims[1], dims[2])
    wz, bz = lin(ks[6], ks[7], dims[2], n_z)
    gamma = jnp.ones((1, n_z), jnp.float32)   # BatchNorm1d affine init
    beta = jnp.zeros((1, n_z), jnp.float32)
    return dict(w1=w1, b1=b1, w2=w2, b2=b2, w3=w3, b3=b3,
                wz=wz, bz=bz, gamma=gamma, beta=beta)


def encoder_ref(x, p):
    """Pure-JAX reference for sanity checking."""
    h1 = jnp.maximum(x @ p["w1"] + p["b1"], 0.0)
    h2 = jnp.maximum(h1 @ p["w2"] + p["b2"], 0.0)
    h3 = jnp.maximum(h2 @ p["w3"] + p["b3"], 0.0)
    z = h3 @ p["wz"] + p["bz"]
    mean = jnp.mean(z, axis=0, keepdims=True)
    var = jnp.mean((z - mean) ** 2, axis=0, keepdims=True)
    return (z - mean) / jnp.sqrt(var + 1e-5) * p["gamma"] + p["beta"]


# TODO(synk): PyTorch BatchNorm1d also updates running_mean/running_var buffers
# in training mode; that side effect does not affect the forward output and is
# not reproduced here.

if __name__ == "__main__":
    # Small shapes consistent with the module: encoder(n_dim=32, dims=[64,64,32], n_z=16)
    B, n_dim, dims, n_z = 8, 32, (64, 64, 32), 16

    key = jax.random.PRNGKey(0)
    kx, kp = jax.random.split(key)
    x = jax.random.normal(kx, (B, n_dim), jnp.float32)
    params = init_params(kp, n_dim, dims, n_z)

    ref = encoder_ref(x, params)

    # f32 path (exact match with the reference).
    out = jax.block_until_ready(encoder_forward(x, params, use_bf16=False))
    assert out.shape == (B, n_z)
    assert jnp.allclose(out, ref, atol=1e-4, rtol=1e-4), "f32 mismatch vs reference"

    # bf16 MXU path (recommended on v6e/v7x: native bf16 systolic array,
    # f32 accumulation + f32 elementwise). Looser tolerance for bf16 operands.
    out_bf16 = jax.block_until_ready(encoder_forward(x, params, use_bf16=True))
    assert out_bf16.shape == (B, n_z)
    assert jnp.allclose(out_bf16, ref, atol=1e-1, rtol=1e-1), "bf16 mismatch vs reference"

    print("KERNEL_OK")
</pallas_src>

<mosaic_0001>
module attributes {stable_mosaic.version = 11 : i64} {
  func.func @encoder_kernel(%arg0: memref<8x128xf32, #tpu.memory_space<vmem>>, %arg1: memref<4x128x128xf32, #tpu.memory_space<vmem>>, %arg2: memref<8x128xf32, #tpu.memory_space<vmem>>, %arg3: memref<8x128xf32, #tpu.memory_space<vmem>>) attributes {dimension_semantics = [], scalar_prefetch = 0 : i64, scratch_operands = 0 : i64, tpu.core_type = #tpu.core_type<tc>} {
    %c0 = arith.constant 0 : index
    %c0_0 = arith.constant 0 : index
    %0 = vector.load %arg0[%c0, %c0_0] : memref<8x128xf32, #tpu.memory_space<vmem>>, vector<8x128xf32>
    %c0_1 = arith.constant 0 : index
    %c0_2 = arith.constant 0 : index
    %c0_3 = arith.constant 0 : index
    %1 = vector.load %arg1[%c0_1, %c0_2, %c0_3] : memref<4x128x128xf32, #tpu.memory_space<vmem>>, vector<1x128x128xf32>
    %2 = vector.shape_cast %1 : vector<1x128x128xf32> to vector<128x128xf32>
    %cst = arith.constant dense<0.000000e+00> : vector<8x128xf32>
    %3 = tpu.matmul %0, %2, %cst {dimension_numbers = #tpu.dot_dimension_numbers<[1], [0], [0], [1], [0, 0, 1, 1], [], []>} : vector<8x128xf32>, vector<128x128xf32>, vector<8x128xf32> -> vector<8x128xf32>
    %c0_4 = arith.constant 0 : index
    %c0_5 = arith.constant 0 : index
    %4 = vector.load %arg2[%c0_4, %c0_5] : memref<8x128xf32, #tpu.memory_space<vmem>>, vector<1x128xf32>
    %5 = vector.broadcast %4 : vector<1x128xf32> to vector<8x128xf32>
    %6 = arith.addf %3, %5 : vector<8x128xf32>
    %cst_6 = arith.constant 0.000000e+00 : f32
    %7 = vector.broadcast %cst_6 : f32 to vector<8x128xf32>
    %8 = arith.maximumf %6, %7 : vector<8x128xf32>
    %c1 = arith.constant 1 : index
    %c0_7 = arith.constant 0 : index
    %c0_8 = arith.constant 0 : index
    %9 = vector.load %arg1[%c1, %c0_7, %c0_8] : memref<4x128x128xf32, #tpu.memory_space<vmem>>, vector<1x128x128xf32>
    %10 = vector.shape_cast %9 : vector<1x128x128xf32> to vector<128x128xf32>
    %cst_9 = arith.constant dense<0.000000e+00> : vector<8x128xf32>
    %11 = tpu.matmul %8, %10, %cst_9 {dimension_numbers = #tpu.dot_dimension_numbers<[1], [0], [0], [1], [0, 0, 1, 1], [], []>} : vector<8x128xf32>, vector<128x128xf32>, vector<8x128xf32> -> vector<8x128xf32>
    %c1_10 = arith.constant 1 : index
    %c0_11 = arith.constant 0 : index
    %12 = vector.load %arg2[%c1_10, %c0_11] : memref<8x128xf32, #tpu.memory_space<vmem>>, vector<1x128xf32>
    %13 = vector.broadcast %12 : vector<1x128xf32> to vector<8x128xf32>
    %14 = arith.addf %11, %13 : vector<8x128xf32>
    %cst_12 = arith.constant 0.000000e+00 : f32
    %15 = vector.broadcast %cst_12 : f32 to vector<8x128xf32>
    %16 = arith.maximumf %14, %15 : vector<8x128xf32>
    %c2 = arith.constant 2 : index
    %c0_13 = arith.constant 0 : index
    %c0_14 = arith.constant 0 : index
    %17 = vector.load %arg1[%c2, %c0_13, %c0_14] : memref<4x128x128xf32, #tpu.memory_space<vmem>>, vector<1x128x128xf32>
    %18 = vector.shape_cast %17 : vector<1x128x128xf32> to vector<128x128xf32>
    %cst_15 = arith.constant dense<0.000000e+00> : vector<8x128xf32>
    %19 = tpu.matmul %16, %18, %cst_15 {dimension_numbers = #tpu.dot_dimension_numbers<[1], [0], [0], [1], [0, 0, 1, 1], [], []>} : vector<8x128xf32>, vector<128x128xf32>, vector<8x128xf32> -> vector<8x128xf32>
    %c2_16 = arith.constant 2 : index
    %c0_17 = arith.constant 0 : index
    %20 = vector.load %arg2[%c2_16, %c0_17] : memref<8x128xf32, #tpu.memory_space<vmem>>, vector<1x128xf32>
    %21 = vector.broadcast %20 : vector<1x128xf32> to vector<8x128xf32>
    %22 = arith.addf %19, %21 : vector<8x128xf32>
    %cst_18 = arith.constant 0.000000e+00 : f32
    %23 = vector.broadcast %cst_18 : f32 to vector<8x128xf32>
    %24 = arith.maximumf %22, %23 : vector<8x128xf32>
    %c3 = arith.constant 3 : index
    %c0_19 = arith.constant 0 : index
    %c0_20 = arith.constant 0 : index
    %25 = vector.load %arg1[%c3, %c0_19, %c0_20] : memref<4x128x128xf32, #tpu.memory_space<vmem>>, vector<1x128x128xf32>
    %26 = vector.shape_cast %25 : vector<1x128x128xf32> to vector<128x128xf32>
    %cst_21 = arith.constant dense<0.000000e+00> : vector<8x128xf32>
    %27 = tpu.matmul %24, %26, %cst_21 {dimension_numbers = #tpu.dot_dimension_numbers<[1], [0], [0], [1], [0, 0, 1, 1], [], []>} : vector<8x128xf32>, vector<128x128xf32>, vector<8x128xf32> -> vector<8x128xf32>
    %c3_22 = arith.constant 3 : index
    %c0_23 = arith.constant 0 : index
    %28 = vector.load %arg2[%c3_22, %c0_23] : memref<8x128xf32, #tpu.memory_space<vmem>>, vector<1x128xf32>
    %29 = vector.broadcast %28 : vector<1x128xf32> to vector<8x128xf32>
    %30 = arith.addf %27, %29 : vector<8x128xf32>
    %cst_24 = arith.constant dense<0.000000e+00> : vector<128xf32>
    %31 = vector.multi_reduction <add>, %30, %cst_24 [0] : vector<8x128xf32> to vector<128xf32>
    %32 = vector.shape_cast %31 : vector<128xf32> to vector<1x128xf32>
    %cst_25 = arith.constant 8.000000e+00 : f32
    %33 = vector.broadcast %cst_25 : f32 to vector<1x128xf32>
    %34 = arith.divf %32, %33 : vector<1x128xf32>
    %35 = vector.broadcast %34 : vector<1x128xf32> to vector<8x128xf32>
    %36 = arith.subf %30, %35 : vector<8x128xf32>
    %37 = vector.broadcast %34 : vector<1x128xf32> to vector<8x128xf32>
    %38 = arith.subf %30, %37 : vector<8x128xf32>
    %39 = arith.mulf %36, %38 : vector<8x128xf32>
    %cst_26 = arith.constant dense<0.000000e+00> : vector<128xf32>
    %40 = vector.multi_reduction <add>, %39, %cst_26 [0] : vector<8x128xf32> to vector<128xf32>
    %41 = vector.shape_cast %40 : vector<128xf32> to vector<1x128xf32>
    %cst_27 = arith.constant 8.000000e+00 : f32
    %42 = vector.broadcast %cst_27 : f32 to vector<1x128xf32>
    %43 = arith.divf %41, %42 : vector<1x128xf32>
    %44 = vector.broadcast %34 : vector<1x128xf32> to vector<8x128xf32>
    %45 = arith.subf %30, %44 : vector<8x128xf32>
    %cst_28 = arith.constant 9.99999974E-6 : f32
    %46 = vector.broadcast %cst_28 : f32 to vector<1x128xf32>
    %47 = arith.addf %43, %46 : vector<1x128xf32>
    %48 = math.rsqrt %47 : vector<1x128xf32>
    %49 = vector.broadcast %48 : vector<1x128xf32> to vector<8x128xf32>
    %50 = arith.mulf %45, %49 : vector<8x128xf32>
    %c4 = arith.constant 4 : index
    %c0_29 = arith.constant 0 : index
    %51 = vector.load %arg2[%c4, %c0_29] : memref<8x128xf32, #tpu.memory_space<vmem>>, vector<1x128xf32>
    %52 = vector.broadcast %51 : vector<1x128xf32> to vector<8x128xf32>
    %53 = arith.mulf %50, %52 : vector<8x128xf32>
    %c5 = arith.constant 5 : index
    %c0_30 = arith.constant 0 : index
    %54 = vector.load %arg2[%c5, %c0_30] : memref<8x128xf32, #tpu.memory_space<vmem>>, vector<1x128xf32>
    %55 = vector.broadcast %54 : vector<1x128xf32> to vector<8x128xf32>
    %56 = arith.addf %53, %55 : vector<8x128xf32>
    %c0_31 = arith.constant 0 : index
    %c0_32 = arith.constant 0 : index
    %57 = vector.load %arg3[%c0_31, %c0_32] : memref<8x128xf32, #tpu.memory_space<vmem>>, vector<8x128xf32>
    tpu.vector_store %arg3[%c0_31, %c0_32], %56 {strides = array<i32>} : memref<8x128xf32, #tpu.memory_space<vmem>>, vector<8x128xf32>,
    return
  }
}

</mosaic_0001>

<bundles_post_ra>
// kernel: tpu_custom_call.1
= control target key start
LH: loop header
LB: loop body
LE: loop exit
PB: predicated region body
PF: predicated region fallthrough
CT: control target
= control target key end

     0   :  { %8 = vsyncpa [#allocation3], 0  ;;  %s894_s0 = inlined_call_operand.hbm [shape: f32[8,128], index: 0, kind: input, shape index: {}]   ;;  %s895_s1 = inlined_call_operand.hbm [shape: f32[4,128,128], index: 1, kind: input, shape index: {}]   ;;  %s896_s2 = inlined_call_operand.hbm [shape: f32[8,128], index: 2, kind: input, shape index: {}]   ;;  %s897_s3 = inlined_call_operand.hbm [shape: f32[8,128], index: 3, kind: output, shape index: {}]  }
   0x1   :  { %9 = vsyncpa [#allocation6], 0 }
   0x2   :  { %10 = vsyncpa [#allocation4], 0  ;;  %s782_s12 = smov [#allocation5]  }
   0x3   :  { %s26_s13 = sshll.u32 %s782_s12, 4  ;;  %s27_s13 = int_to_ptr.vmem [resolvable:$true] %s26_s13 }
   0x4   :  { %s704_s14 = scalar_lea.vmem %s27_s13, 8192  ;;  %p709_p1 = scmp.lt.s32.totalorder %s27_s13, %s27_s13 }
   0x5   :  { %p705_p0 = scmp.ne.s32.totalorder %s27_s13, %s704_s14  ;;  %p710_p2 = scmp.lt.s32.totalorder %s704_s14, %s704_s14 }
   0x7   :  { %p711_p3 = por %p710_p2, %p709_p1 }
   0x9   :  { %p712_p4 = pnand %p711_p3, %p705_p0 }
   0xb   :  { %715 = shalt.err (!%p712_p4)
}
   0xc   :  { %s783_s15 = smov 128   ;;  %s784_s16 = smov 8  }
   0xd   :  { %32 = dma.hbm_to_vmem [thread:$0]  %s895_s1, 8192, %s27_s13, [#allocation6], %s783_s15, %s783_s15, %s784_s16  }
   0xe   :  { %s785_s19 = smov [#allocation2]   ;;  %s786_s21 = smov [#allocation7]  }
   0xf   :  { %s17_s20 = sshll.u32 %s785_s19, 4  ;;  %s39_s22 = sshll.u32 %s786_s21, 4  ;;  %s18_s20 = int_to_ptr.vmem [resolvable:$true] %s17_s20  ;;  %s40_s22 = int_to_ptr.vmem [resolvable:$true] %s39_s22 }
  0x10   :  { %s724_s23 = scalar_lea.vmem %s18_s20, 128  ;;  %p729_p6 = scmp.lt.s32.totalorder %s18_s20, %s18_s20 }
  0x11   :  { %p725_p5 = scmp.ne.s32.totalorder %s18_s20, %s724_s23  ;;  %p730_p7 = scmp.lt.s32.totalorder %s724_s23, %s724_s23 }
  0x13   :  { %p731_p8 = por %p730_p7, %p729_p6 }
  0x15   :  { %p732_p9 = pnand %p731_p8, %p725_p5 }
  0x17   :  { %735 = shalt.err (!%p732_p9)
}
  0x18   :  { %20 = dma.hbm_to_vmem [thread:$0]  %s894_s0, 128, %s18_s20, [#allocation3]  }
  0x19   :  { %s744_s26 = scalar_lea.vmem %s40_s22, 128  ;;  %p749_p11 = scmp.lt.s32.totalorder %s40_s22, %s40_s22 }
  0x1a   :  { %p745_p10 = scmp.ne.s32.totalorder %s40_s22, %s744_s26  ;;  %p750_p12 = scmp.lt.s32.totalorder %s744_s26, %s744_s26 }
  0x1c   :  { %p751_p13 = por %p750_p12, %p749_p11 }
  0x1e   :  { %p752_p0 = pnand %p751_p13, %p745_p10 }
  0x20   :  { %755 = shalt.err (!%p752_p0)
}
  0x21   :  { %42 = dma.hbm_to_vmem [thread:$0]  %s896_s2, 128, %s40_s22, [#allocation6]  }
  0x22   :  { %776 = dma.done.wait [#allocation3], 128  }
  0x23   :  { %777 = vsyncadd [#allocation3], 4294967168 }
  0x24   :  { %778 = dma.done.wait [#allocation6], 8320  }
  0x25   :  { %779 = vsyncadd [#allocation6], 4294958976  ;;  %v787_v0 = vmov 0.0   ;;  %vm788_vm0 = vmmov 0   ;;  %v68_v1 = vld [vmem:[#allocation5 + $0x78] sm:$0xff]  ;;  %v67_v2 = vld [vmem:[#allocation5 + $0x70] sm:$0xff] }
  0x26   :  { %546 = vmatprep.subr.mxu0 %v787_v0  ;;  %578 = vmatprep.mubr.msk.f32.mxu0 %vm788_vm0, %v787_v0  ;;  %v66_v3 = vld [vmem:[#allocation5 + $0x68] sm:$0xff]  ;;  %v65_v4 = vld [vmem:[#allocation5 + $0x60] sm:$0xff]  ;;  %v161_v5 = vld [vmem:[#allocation5 + $0xf8] sm:$0xff]  ;;  %s789_s0 = smov [#allocation8]  }
  0x27   :  { %581 = vmatprep.subr.mxu1 %v787_v0  ;;  %613 = vmatprep.mubr.msk.f32.mxu1 %vm788_vm0, %v787_v0  ;;  %v64_v6 = vld [vmem:[#allocation5 + $0x58] sm:$0xff]  ;;  %v160_v7 = vld [vmem:[#allocation5 + $0xf0] sm:$0xff]  ;;  %v159_v8 = vld [vmem:[#allocation5 + $0xe8] sm:$0xff]  ;;  %s462_s2 = sshll.u32 %s789_s0, 4  ;;  %s463_s2 = int_to_ptr.vmem [resolvable:$true] %s462_s2 }
  0x28   :  { %547 = vmatpush3.msra.mxu0 %v68_v1  ;;  %582 = vmatpush3.msra.mxu1 %v161_v5  ;;  %v63_v9 = vld [vmem:[#allocation5 + $0x50] sm:$0xff]  ;;  %v158_v10 = vld [vmem:[#allocation5 + $0xe0] sm:$0xff]  ;;  %v62_v11 = vld [vmem:[#allocation5 + $0x48] sm:$0xff]  ;;  %s756_s28 = scalar_lea.vmem %s463_s2, 128  ;;  %p761_p2 = scmp.lt.s32.totalorder %s463_s2, %s463_s2 }
  0x29   :  { %548 = vmatprep.subr.mxu0 %v787_v0  ;;  %583 = vmatprep.subr.mxu1 %v787_v0  ;;  %v157_v12 = vld [vmem:[#allocation5 + $0xd8] sm:$0xff]  ;;  %v61_v13 = vld [vmem:[#allocation5 + $0x40] sm:$0xff]  ;;  %v156_v14 = vld [vmem:[#allocation5 + $0xd0] sm:$0xff]  ;;  %p757_p1 = scmp.ne.s32.totalorder %s463_s2, %s756_s28  ;;  %p762_p3 = scmp.lt.s32.totalorder %s756_s28, %s756_s28 }
  0x2a   :  { %549 = vmatpush3.msra.mxu0 %v67_v2  ;;  %584 = vmatpush3.msra.mxu1 %v160_v7  ;;  %v60_v15 = vld [vmem:[#allocation5 + $0x38] sm:$0xff]  ;;  %v155_v16 = vld [vmem:[#allocation5 + $0xc8] sm:$0xff]  ;;  %v59_v17 = vld [vmem:[#allocation5 + $0x30] sm:$0xff] }
  0x2b   :  { %550 = vmatprep.subr.mxu0 %v787_v0  ;;  %585 = vmatprep.subr.mxu1 %v787_v0  ;;  %v154_v18 = vld [vmem:[#allocation5 + $0xc0] sm:$0xff]  ;;  %v58_v19 = vld [vmem:[#allocation5 + $0x28] sm:$0xff]  ;;  %v153_v20 = vld [vmem:[#allocation5 + $0xb8] sm:$0xff]  ;;  %p763_p4 = por %p762_p3, %p761_p2 }
  0x2c   :  { %551 = vmatpush3.msra.mxu0 %v66_v3  ;;  %586 = vmatpush3.msra.mxu1 %v159_v8  ;;  %v57_v21 = vld [vmem:[#allocation5 + $0x20] sm:$0xff]  ;;  %v152_v22 = vld [vmem:[#allocation5 + $0xb0] sm:$0xff]  ;;  %v56_v23 = vld [vmem:[#allocation5 + $0x18] sm:$0xff] }
  0x2d   :  { %552 = vmatprep.subr.mxu0 %v787_v0  ;;  %587 = vmatprep.subr.mxu1 %v787_v0  ;;  %v151_v24 = vld [vmem:[#allocation5 + $0xa8] sm:$0xff]  ;;  %v55_v25 = vld [vmem:[#allocation5 + $0x10] sm:$0xff]  ;;  %v150_v26 = vld [vmem:[#allocation5 + $0xa0] sm:$0xff]  ;;  %p764_p5 = pnand %p763_p4, %p757_p1 }
  0x2e   :  { %553 = vmatpush3.msra.mxu0 %v65_v4  ;;  %588 = vmatpush3.msra.mxu1 %v158_v10  ;;  %v54_v27 = vld [vmem:[#allocation5 + $0x8] sm:$0xff]  ;;  %v149_v28 = vld [vmem:[#allocation5 + $0x98] sm:$0xff]  ;;  %v53_v29 = vld [vmem:[#allocation5] sm:$0xff] }
  0x2f   :  { %554 = vmatprep.subr.mxu0 %v787_v0  ;;  %589 = vmatprep.subr.mxu1 %v787_v0  ;;  %v52_v30 = vld [vmem:[#allocation2] sm:$0xff]  ;;  %v148_v31 = vld [vmem:[#allocation5 + $0x90] sm:$0xff]  ;;  %v147_v32 = vld [vmem:[#allocation5 + $0x88] sm:$0xff] }
  0x30   :  { %555 = vmatpush3.msra.mxu0 %v64_v6  ;;  %590 = vmatpush3.msra.mxu1 %v157_v12  ;;  %v146_v33 = vld [vmem:[#allocation5 + $0x80] sm:$0xff]  ;;  %v254_v34 = vld [vmem:[#allocation5 + $0x178] sm:$0xff]  ;;  %v253_v35 = vld [vmem:[#allocation5 + $0x170] sm:$0xff] }
  0x31   :  { %556 = vmatprep.subr.mxu0 %v787_v0  ;;  %591 = vmatprep.subr.mxu1 %v787_v0  ;;  %v252_v36 = vld [vmem:[#allocation5 + $0x168] sm:$0xff]  ;;  %v251_v37 = vld [vmem:[#allocation5 + $0x160] sm:$0xff]  ;;  %v250_v38 = vld [vmem:[#allocation5 + $0x158] sm:$0xff] }
  0x32   :  { %557 = vmatpush3.msra.mxu0 %v63_v9  ;;  %592 = vmatpush3.msra.mxu1 %v156_v14  ;;  %v249_v39 = vld [vmem:[#allocation5 + $0x150] sm:$0xff]  ;;  %v248_v40 = vld [vmem:[#allocation5 + $0x148] sm:$0xff]  ;;  %v247_v41 = vld [vmem:[#allocation5 + $0x140] sm:$0xff] }
  0x33   :  { %558 = vmatprep.subr.mxu0 %v787_v0  ;;  %593 = vmatprep.subr.mxu1 %v787_v0  ;;  %v246_v42 = vld [vmem:[#allocation5 + $0x138] sm:$0xff]  ;;  %v245_v43 = vld [vmem:[#allocation5 + $0x130] sm:$0xff]  ;;  %v244_v44 = vld [vmem:[#allocation5 + $0x128] sm:$0xff] }
  0x34   :  { %559 = vmatpush3.msra.mxu0 %v62_v11  ;;  %594 = vmatpush3.msra.mxu1 %v155_v16  ;;  %v243_v45 = vld [vmem:[#allocation5 + $0x120] sm:$0xff]  ;;  %v242_v46 = vld [vmem:[#allocation5 + $0x118] sm:$0xff]  ;;  %v241_v52 = vld [vmem:[#allocation5 + $0x110] sm:$0xff] }
  0x35   :  { %560 = vmatprep.subr.mxu0 %v787_v0  ;;  %595 = vmatprep.subr.mxu1 %v787_v0  ;;  %v472_v47 = vld [vmem:[#allocation7] ss:$0 sm:$0xff]  ;;  %v240_v53 = vld [vmem:[#allocation5 + $0x108] sm:$0xff]  ;;  %v347_v55 = vld [vmem:[#allocation5 + $0x1f8] sm:$0xff] }
  0x36   :  { %561 = vmatpush3.msra.mxu0 %v61_v13  ;;  %596 = vmatpush3.msra.mxu1 %v154_v18  ;;  %v239_v54 = vld [vmem:[#allocation5 + $0x100] sm:$0xff]  ;;  %v346_v56 = vld [vmem:[#allocation5 + $0x1f0] sm:$0xff]  ;;  %v345_v57 = vld [vmem:[#allocation5 + $0x1e8] sm:$0xff] }
  0x37   :  { %562 = vmatprep.subr.mxu0 %v787_v0  ;;  %597 = vmatprep.subr.mxu1 %v787_v0  ;;  %v344_v58 = vld [vmem:[#allocation5 + $0x1e0] sm:$0xff]  ;;  %v343_v59 = vld [vmem:[#allocation5 + $0x1d8] sm:$0xff]  ;;  %v342_v60 = vld [vmem:[#allocation5 + $0x1d0] sm:$0xff] }
  0x38   :  { %563 = vmatpush3.msra.mxu0 %v60_v15  ;;  %598 = vmatpush3.msra.mxu1 %v153_v20  ;;  %v341_v61 = vld [vmem:[#allocation5 + $0x1c8] sm:$0xff]  ;;  %v340_v62 = vld [vmem:[#allocation5 + $0x1c0] sm:$0xff]  ;;  %v339_v63 = vld [vmem:[#allocation5 + $0x1b8] sm:$0xff] }
  0x39   :  { %564 = vmatprep.subr.mxu0 %v787_v0  ;;  %599 = vmatprep.subr.mxu1 %v787_v0  ;;  %v338_v1 = vld [vmem:[#allocation5 + $0x1b0] sm:$0xff]  ;;  %v337_v2 = vld [vmem:[#allocation5 + $0x1a8] sm:$0xff]  ;;  %v336_v3 = vld [vmem:[#allocation5 + $0x1a0] sm:$0xff] }
  0x3a   :  { %565 = vmatpush3.msra.mxu0 %v59_v17  ;;  %600 = vmatpush3.msra.mxu1 %v152_v22  ;;  %v335_v4 = vld [vmem:[#allocation5 + $0x198] sm:$0xff]  ;;  %v473_v5 = vld [vmem:[#allocation7 + $0x1] ss:$0 sm:$0xff]  ;;  %v334_v10 = vld [vmem:[#allocation5 + $0x190] sm:$0xff] }
  0x3b   :  { %566 = vmatprep.subr.mxu0 %v787_v0  ;;  %601 = vmatprep.subr.mxu1 %v787_v0  ;;  %v333_v11 = vld [vmem:[#allocation5 + $0x188] sm:$0xff]  ;;  %v332_v12 = vld [vmem:[#allocation5 + $0x180] sm:$0xff] }
  0x3c   :  { %567 = vmatpush3.msra.mxu0 %v58_v19  ;;  %602 = vmatpush3.msra.mxu1 %v151_v24  ;;  %v474_v13 = vld [vmem:[#allocation7 + $0x2] ss:$0 sm:$0xff]  ;;  %v475_v18 = vld [vmem:[#allocation7 + $0x3] ss:$0 sm:$0xff] }
  0x3d   :  { %568 = vmatprep.subr.mxu0 %v787_v0  ;;  %603 = vmatprep.subr.mxu1 %v787_v0 }
  0x3e   :  { %569 = vmatpush3.msra.mxu0 %v57_v21  ;;  %604 = vmatpush3.msra.mxu1 %v150_v26 }
  0x3f   :  { %570 = vmatprep.subr.mxu0 %v787_v0  ;;  %605 = vmatprep.subr.mxu1 %v787_v0 }
  0x40   :  { %571 = vmatpush3.msra.mxu0 %v56_v23  ;;  %606 = vmatpush3.msra.mxu1 %v149_v28 }
  0x41   :  { %572 = vmatprep.subr.mxu0 %v787_v0  ;;  %607 = vmatprep.subr.mxu1 %v787_v0 }
  0x42   :  { %573 = vmatpush3.msra.mxu0 %v55_v25  ;;  %608 = vmatpush3.msra.mxu1 %v148_v31 }
  0x43   :  { %574 = vmatprep.subr.mxu0 %v787_v0  ;;  %609 = vmatprep.subr.mxu1 %v787_v0 }
  0x44   :  { %575 = vmatpush3.msra.mxu0 %v54_v27  ;;  %610 = vmatpush3.msra.mxu1 %v147_v32 }
  0x45   :  { %576 = vmatprep.subr.mxu0 %v787_v0  ;;  %611 = vmatprep.subr.mxu1 %v787_v0 }
  0x46   :  { %577 = vmatpush3.msra.mxu0 %v53_v29  ;;  %612 = vmatpush3.msra.mxu1 %v146_v33 }
  0x47   :  { %579 = vmatmul.mubr.f32.vlgmr.msra.gmra.mxu0 %v52_v30  ;;  %616 = vmatprep.subr.mxu0 %v787_v0 }
  0x48   :  { %648 = vmatprep.mubr.msk.f32.mxu0 %vm788_vm0, %v787_v0  ;;  %651 = vmatprep.subr.mxu1 %v787_v0 }
  0x49   :  { %617 = vmatpush3.msra.mxu0 %v254_v34 }
  0x4a   :  { %618 = vmatprep.subr.mxu0 %v787_v0 }
  0x4b   :  { %619 = vmatpush3.msra.mxu0 %v253_v35 }
  0x4c   :  { %620 = vmatprep.subr.mxu0 %v787_v0 }
  0x4d   :  { %621 = vmatpush3.msra.mxu0 %v252_v36 }
  0x4e   :  { %622 = vmatprep.subr.mxu0 %v787_v0 }
  0x4f   :  { %623 = vmatpush3.msra.mxu0 %v251_v37 }
  0x50   :  { %624 = vmatprep.subr.mxu0 %v787_v0 }
  0x51   :  { %625 = vmatpush3.msra.mxu0 %v250_v38 }
  0x52   :  { %626 = vmatprep.subr.mxu0 %v787_v0 }
  0x53   :  { %627 = vmatpush3.msra.mxu0 %v249_v39  ;;  %v476_v39 = vld [vmem:[#allocation7 + $0x4] ss:$0 sm:$0xff] }
  0x54   :  { %628 = vmatprep.subr.mxu0 %v787_v0 }
  0x55   :  { %629 = vmatpush3.msra.mxu0 %v248_v40 }
  0x56   :  { %630 = vmatprep.subr.mxu0 %v787_v0 }
  0x57   :  { %631 = vmatpush3.msra.mxu0 %v247_v41  ;;  %v477_v41 = vld [vmem:[#allocation7 + $0x5] ss:$0 sm:$0xff] }
  0x58   :  { %632 = vmatprep.subr.mxu0 %v787_v0 }
  0x59   :  { %633 = vmatpush3.msra.mxu0 %v246_v42 }
  0x5a   :  { %634 = vmatprep.subr.mxu0 %v787_v0 }
  0x5b   :  { %635 = vmatpush3.msra.mxu0 %v245_v43 }
  0x5c   :  { %636 = vmatprep.subr.mxu0 %v787_v0 }
  0x5d   :  { %637 = vmatpush3.msra.mxu0 %v244_v44 }
  0x5e   :  { %638 = vmatprep.subr.mxu0 %v787_v0 }
  0x5f   :  { %639 = vmatpush3.msra.mxu0 %v243_v45 }
  0x60   :  { %640 = vmatprep.subr.mxu0 %v787_v0 }
  0x61   :  { %641 = vmatpush3.msra.mxu0 %v242_v46 }
  0x62   :  { %642 = vmatprep.subr.mxu0 %v787_v0 }
  0x63   :  { %643 = vmatpush3.msra.mxu0 %v241_v52 }
  0x64   :  { %644 = vmatprep.subr.mxu0 %v787_v0 }
  0x65   :  { %645 = vmatpush3.msra.mxu0 %v240_v53 }
  0x66   :  { %646 = vmatprep.subr.mxu0 %v787_v0 }
  0x67   :  { %647 = vmatpush3.msra.mxu0 %v239_v54 }
 0x107   :  { %v140_v48 = vpop.f32.mrf.mxu0 }
 0x108   :  { %v141_v49 = vadd.f32 %v472_v47, %v140_v48 }
 0x109   :  { %v580_v50 = vpop.f32.mrf.mxu0 }
 0x10a   :  { %v144_v51 = vmax.f32 %v141_v49, 0.0 }
 0x10c   :  { %614 = vmatmul.mubr.f32.vlgmr.msra.gmra.mxu1 %v144_v51 }
 0x10d   :  { %683 = vmatprep.mubr.msk.f32.mxu1 %vm788_vm0, %v787_v0  ;;  %652 = vmatpush3.msra.mxu1 %v347_v55 }
 0x10e   :  { %653 = vmatprep.subr.mxu1 %v787_v0 }
 0x10f   :  { %654 = vmatpush3.msra.mxu1 %v346_v56 }
 0x110   :  { %655 = vmatprep.subr.mxu1 %v787_v0 }
 0x111   :  { %656 = vmatpush3.msra.mxu1 %v345_v57 }
 0x112   :  { %657 = vmatprep.subr.mxu1 %v787_v0 }
 0x113   :  { %658 = vmatpush3.msra.mxu1 %v344_v58 }
 0x114   :  { %659 = vmatprep.subr.mxu1 %v787_v0 }
 0x115   :  { %660 = vmatpush3.msra.mxu1 %v343_v59 }
 0x116   :  { %661 = vmatprep.subr.mxu1 %v787_v0 }
 0x117   :  { %662 = vmatpush3.msra.mxu1 %v342_v60 }
 0x118   :  { %663 = vmatprep.subr.mxu1 %v787_v0 }
 0x119   :  { %664 = vmatpush3.msra.mxu1 %v341_v61 }
 0x11a   :  { %665 = vmatprep.subr.mxu1 %v787_v0 }
 0x11b   :  { %666 = vmatpush3.msra.mxu1 %v340_v62 }
 0x11c   :  { %667 = vmatprep.subr.mxu1 %v787_v0 }
 0x11d   :  { %668 = vmatpush3.msra.mxu1 %v339_v63 }
 0x11e   :  { %669 = vmatprep.subr.mxu1 %v787_v0 }
 0x11f   :  { %670 = vmatpush3.msra.mxu1 %v338_v1 }
 0x120   :  { %671 = vmatprep.subr.mxu1 %v787_v0 }
 0x121   :  { %672 = vmatpush3.msra.mxu1 %v337_v2 }
 0x122   :  { %673 = vmatprep.subr.mxu1 %v787_v0 }
 0x123   :  { %674 = vmatpush3.msra.mxu1 %v336_v3 }
 0x124   :  { %675 = vmatprep.subr.mxu1 %v787_v0 }
 0x125   :  { %676 = vmatpush3.msra.mxu1 %v335_v4 }
 0x126   :  { %677 = vmatprep.subr.mxu1 %v787_v0 }
 0x127   :  { %678 = vmatpush3.msra.mxu1 %v334_v10 }
 0x128   :  { %679 = vmatprep.subr.mxu1 %v787_v0 }
 0x129   :  { %680 = vmatpush3.msra.mxu1 %v333_v11 }
 0x12a   :  { %681 = vmatprep.subr.mxu1 %v787_v0 }
 0x12b   :  { %682 = vmatpush3.msra.mxu1 %v332_v12 }
 0x1cc   :  { %v233_v6 = vpop.f32.mrf.mxu1 }
 0x1cd   :  { %v234_v7 = vadd.f32 %v473_v5, %v233_v6 }
 0x1ce   :  { %v615_v8 = vpop.f32.mrf.mxu1 }
 0x1cf   :  { %v237_v9 = vmax.f32 %v234_v7, 0.0 }
 0x1d1   :  { %649 = vmatmul.mubr.f32.vlgmr.msra.gmra.mxu0 %v237_v9 }
 0x291   :  { %v326_v14 = vpop.f32.mrf.mxu0 }
 0x292   :  { %v327_v15 = vadd.f32 %v474_v13, %v326_v14 }
 0x293   :  { %v650_v16 = vpop.f32.mrf.mxu0 }
 0x294   :  { %v330_v17 = vmax.f32 %v327_v15, 0.0 }
 0x296   :  { %684 = vmatmul.mubr.f32.vlgmr.msra.gmra.mxu1 %v330_v17 }
 0x356   :  { %v419_v19 = vpop.f32.mrf.mxu1 }
 0x357   :  { %v420_v20 = vadd.f32 %v475_v18, %v419_v19 }
 0x358   :  { %v685_v21 = vpop.f32.mrf.mxu1 }
 0x359   :  { %v423_v22 = vrot.slane %v420_v20, 4 }
 0x35b   :  { %v424_v23 = vadd.f32 %v423_v22, %v420_v20 }
 0x35d   :  { %v425_v24 = vrot.slane %v424_v23, 2 }
 0x35f   :  { %v426_v25 = vadd.f32 %v425_v24, %v424_v23 }
 0x361   :  { %v427_v26 = vrot.slane %v426_v25, 1 }
 0x363   :  { %v428_v27 = vadd.f32 %v427_v26, %v426_v25 }
 0x365   :  { %v430_v28 = vmul.f32 0.125, %v428_v27 }
 0x367   :  { %v431_v0 = vsub.f32 %v420_v20, %v430_v28 }
 0x369   :  { %v432_v29 = vmul.f32 %v431_v0, %v431_v0 }
 0x36b   :  { %v433_v30 = vrot.slane %v432_v29, 4 }
 0x36d   :  { %v434_v31 = vadd.f32 %v433_v30, %v432_v29 }
 0x36f   :  { %v435_v32 = vrot.slane %v434_v31, 2 }
 0x371   :  { %v436_v33 = vadd.f32 %v435_v32, %v434_v31 }
 0x373   :  { %v437_v34 = vrot.slane %v436_v33, 1 }
 0x375   :  { %v438_v35 = vadd.f32 %v437_v34, %v436_v33 }
 0x377   :  { %v439_v36 = vmul.f32 0.125, %v438_v35 }
 0x379   :  { %v440_v37 = vadd.f32 1e-05, %v439_v36 }
 0x37b   :  { %694 = vrsqrt.f32 %v440_v37 }
 0x388   :  { %v695_v38 = vpop.eup %694 }
 0x389   :  { %v442_v40 = vmul.f32 %v695_v38, %v431_v0 }
 0x38b   :  { %v448_v42 = vmul.f32 %v476_v39, %v442_v40 }
 0x38d   :  { %v454_v43 = vadd.f32 %v477_v41, %v448_v42 }
 0x38f   :  { %455 = vst [vmem:[#allocation8] sm:$0xff] %v454_v43 }
 0x390   :  { %767 = shalt.err (!%p764_p5)
}
 0x391   :  { %465 = dma.vmem_to_hbm [thread:$0]  %s463_s2, 128, %s897_s3, [#allocation4]  }
 0x392   :  { %780 = dma.done.wait [#allocation4], 128  }
 0x393   :  { %781 = vsyncadd [#allocation4], 4294967168 }
 0x394   :  { %469 = vsyncpa [#allocation3], 1 }
 0x395   :  { %470 = vsyncpa [#allocation6], 1 }
 0x396   :  { %471 = vsyncpa [#allocation4], 1 }

</bundles_post_ra>
